<compile_context>
chip_gen: v6e
topology: v6e:2x2x1
jax: 0.10.0
libtpu: 0.0.40
codegen_flags: <defaults>
</compile_context>

<pallas_src>
import jax
import jax.numpy as jnp
from jax import lax
from jax.experimental import pallas as pl
from jax.experimental.pallas import tpu as pltpu


def maws_kernel(w_ref, c_ref, idx_ref):
    # w_ref:   (1, H, L)  = x[b, :, 0, :]   (attention row 0, all heads)
    # c_ref:   (1, H, L)  = contributions[b]
    # idx_ref: (1, 1, L)  int32 output: descending argsort of scores
    L = idx_ref.shape[-1]

    weights = jnp.mean(w_ref[0], axis=0, keepdims=True)          # (1, L)
    contrib = jnp.mean(c_ref[0], axis=0, keepdims=True)          # (1, L)
    s_row = (contrib * weights).astype(jnp.float32)              # (1, L) scores

    # ---- stable descending argsort via rank matrix (no transpose) ----------
    # TODO(synk): torch.argsort's unspecified tie order is replaced here by a
    #             stable lowest-index-first tie-break (matches jnp.argsort).
    row_i = lax.broadcasted_iota(jnp.int32, (L, L), 0)           # i along sublanes
    col_k = lax.broadcasted_iota(jnp.int32, (L, L), 1)           # k along lanes

    s_k = jnp.broadcast_to(s_row, (L, L))                        # s[k] per column
    # lane -> sublane "transpose" of the score vector: mask the diagonal and
    # lane-reduce (exact: single nonzero per row).
    s_col = jnp.sum(jnp.where(row_i == col_k, s_k, 0.0),
                    axis=1, keepdims=True)                       # (L, 1) = s[i]
    s_i = jnp.broadcast_to(s_col, (L, L))                        # s[i] per row

    # element k precedes element i in a stable descending sort
    before = jnp.logical_or(s_k > s_i,
                            jnp.logical_and(s_k == s_i, col_k < row_i))
    rank = jnp.sum(before.astype(jnp.float32), axis=1,
                   keepdims=True)                                # (L, 1), integer-valued

    # invert the permutation: out[j] = sum_i i * (rank[i] == j)
    onehot = (jnp.broadcast_to(rank, (L, L)) ==
              col_k.astype(jnp.float32)).astype(jnp.float32)     # rows = i, cols = j
    out = jnp.sum(onehot * row_i.astype(jnp.float32), axis=0,
                  keepdims=True)                                 # (1, L)
    idx_ref[0] = out.astype(jnp.int32)


@jax.jit
def maws_forward(x, contributions):
    """x: (B, H, L, L) attention; contributions: (B, H, L). Returns (None, idx)."""
    B, H, L, _ = x.shape
    # Cheap XLA slice: only attention row 0 is ever needed by the kernel.
    x_row0 = x[:, :, 0, :]                                       # (B, H, L)

    idx = pl.pallas_call(
        maws_kernel,
        out_shape=jax.ShapeDtypeStruct((B, 1, L), jnp.int32),
        grid_spec=pltpu.PrefetchScalarGridSpec(
            num_scalar_prefetch=0,
            grid=(B,),
            in_specs=[
                pl.BlockSpec((1, H, L), lambda b: (b, 0, 0)),
                pl.BlockSpec((1, H, L), lambda b: (b, 0, 0)),
            ],
            out_specs=pl.BlockSpec((1, 1, L), lambda b: (b, 0, 0)),
        ),
        compiler_params=pltpu.CompilerParams(
            dimension_semantics=("parallel",)),
    )(x_row0, contributions)
    return None, idx.reshape(B, L)


def reference_forward(x, contributions):
    """Plain-JAX mirror of the PyTorch MAWS.forward (eval semantics)."""
    contrib = contributions.mean(axis=1)                         # (B, L)
    weights = x[:, :, 0, :].mean(axis=1)                         # (B, L)
    scores = contrib * weights
    max_inx = jnp.argsort(-scores, axis=1)                       # descending, stable
    return None, max_inx


if __name__ == "__main__":
    # Small config: batch=2, heads=4, sequence length=16.
    B, H, L = 2, 4, 16
    key = jax.random.PRNGKey(0)
    kx, kc = jax.random.split(key)
    x = jax.random.normal(kx, (B, H, L, L), dtype=jnp.float32)
    contributions = jax.random.normal(kc, (B, H, L), dtype=jnp.float32)

    none_out, max_inx = maws_forward(x, contributions)
    max_inx = jax.block_until_ready(max_inx)

    _, ref_inx = reference_forward(x, contributions)
    assert none_out is None
    assert max_inx.shape == (B, L), max_inx.shape
    assert max_inx.dtype == jnp.int32, max_inx.dtype
    assert jnp.array_equal(max_inx, ref_inx), (max_inx, ref_inx)

    print("KERNEL_OK")
</pallas_src>

<mosaic_0001>
module attributes {stable_mosaic.version = 11 : i64} {
  func.func @maws_kernel(%arg0: i32, %arg1: memref<1x4x16xf32, #tpu.memory_space<vmem>>, %arg2: memref<1x4x16xf32, #tpu.memory_space<vmem>>, %arg3: memref<1x1x16xi32, #tpu.memory_space<vmem>>) attributes {dimension_semantics = [#tpu.dimension_semantics<parallel>], iteration_bounds = array<i64: 2>, scalar_prefetch = 0 : i64, scratch_operands = 0 : i64, tpu.core_type = #tpu.core_type<tc>, window_params = [{transform_indices = @transform_0, window_bounds = array<i64: 1, 4, 16>}, {transform_indices = @transform_1, window_bounds = array<i64: 1, 4, 16>}, {transform_indices = @transform_2, window_bounds = array<i64: 1, 1, 16>}]} {
    %c0 = arith.constant 0 : index
    %c0_0 = arith.constant 0 : index
    %c0_1 = arith.constant 0 : index
    %0 = vector.load %arg1[%c0, %c0_0, %c0_1] : memref<1x4x16xf32, #tpu.memory_space<vmem>>, vector<1x4x16xf32>
    %1 = vector.shape_cast %0 : vector<1x4x16xf32> to vector<4x16xf32>
    %cst = arith.constant dense<0.000000e+00> : vector<16xf32>
    %2 = vector.multi_reduction <add>, %1, %cst [0] : vector<4x16xf32> to vector<16xf32>
    %3 = vector.shape_cast %2 : vector<16xf32> to vector<1x16xf32>
    %cst_2 = arith.constant 4.000000e+00 : f32
    %4 = vector.broadcast %cst_2 : f32 to vector<1x16xf32>
    %5 = arith.divf %3, %4 : vector<1x16xf32>
    %c0_3 = arith.constant 0 : index
    %c0_4 = arith.constant 0 : index
    %c0_5 = arith.constant 0 : index
    %6 = vector.load %arg2[%c0_3, %c0_4, %c0_5] : memref<1x4x16xf32, #tpu.memory_space<vmem>>, vector<1x4x16xf32>
    %7 = vector.shape_cast %6 : vector<1x4x16xf32> to vector<4x16xf32>
    %cst_6 = arith.constant dense<0.000000e+00> : vector<16xf32>
    %8 = vector.multi_reduction <add>, %7, %cst_6 [0] : vector<4x16xf32> to vector<16xf32>
    %9 = vector.shape_cast %8 : vector<16xf32> to vector<1x16xf32>
    %cst_7 = arith.constant 4.000000e+00 : f32
    %10 = vector.broadcast %cst_7 : f32 to vector<1x16xf32>
    %11 = arith.divf %9, %10 : vector<1x16xf32>
    %12 = arith.mulf %11, %5 : vector<1x16xf32>
    %13 = tpu.iota {dimensions = array<i32: 0>} : vector<16x16xi32>
    %14 = tpu.iota {dimensions = array<i32: 1>} : vector<16x16xi32>
    %15 = vector.shape_cast %12 : vector<1x16xf32> to vector<1x16xf32>
    %16 = vector.broadcast %15 : vector<1x16xf32> to vector<16x16xf32>
    %17 = arith.cmpi eq, %13, %14 : vector<16x16xi32>
    %cst_8 = arith.constant 0.000000e+00 : f32
    %18 = vector.broadcast %cst_8 : f32 to vector<16x16xf32>
    %19 = arith.select %17, %16, %18 : vector<16x16xi1>, vector<16x16xf32>
    %cst_9 = arith.constant dense<0.000000e+00> : vector<16xf32>
    %20 = vector.multi_reduction <add>, %19, %cst_9 [1] : vector<16x16xf32> to vector<16xf32>
    %21 = vector.shape_cast %20 : vector<16xf32> to vector<16x1xf32>
    %22 = vector.shape_cast %21 : vector<16x1xf32> to vector<16x1xf32>
    %23 = vector.broadcast %22 : vector<16x1xf32> to vector<16x16xf32>
    %24 = arith.cmpf ogt, %16, %23 : vector<16x16xf32>
    %25 = arith.cmpf oeq, %16, %23 : vector<16x16xf32>
    %26 = arith.cmpi slt, %14, %13 : vector<16x16xi32>
    %27 = arith.andi %25, %26 : vector<16x16xi1>
    %28 = arith.ori %24, %27 : vector<16x16xi1>
    %29 = arith.extui %28 : vector<16x16xi1> to vector<16x16xi32>
    %30 = arith.sitofp %29 : vector<16x16xi32> to vector<16x16xf32>
    %cst_10 = arith.constant dense<0.000000e+00> : vector<16xf32>
    %31 = vector.multi_reduction <add>, %30, %cst_10 [1] : vector<16x16xf32> to vector<16xf32>
    %32 = vector.shape_cast %31 : vector<16xf32> to vector<16x1xf32>
    %33 = vector.shape_cast %32 : vector<16x1xf32> to vector<16x1xf32>
    %34 = vector.broadcast %33 : vector<16x1xf32> to vector<16x16xf32>
    %35 = arith.sitofp %14 : vector<16x16xi32> to vector<16x16xf32>
    %36 = arith.cmpf oeq, %34, %35 : vector<16x16xf32>
    %37 = arith.extui %36 : vector<16x16xi1> to vector<16x16xi32>
    %38 = arith.sitofp %37 : vector<16x16xi32> to vector<16x16xf32>
    %39 = arith.sitofp %13 : vector<16x16xi32> to vector<16x16xf32>
    %40 = arith.mulf %38, %39 : vector<16x16xf32>
    %cst_11 = arith.constant dense<0.000000e+00> : vector<16xf32>
    %41 = vector.multi_reduction <add>, %40, %cst_11 [0] : vector<16x16xf32> to vector<16xf32>
    %42 = vector.shape_cast %41 : vector<16xf32> to vector<1x16xf32>
    %43 = arith.fptosi %42 : vector<1x16xf32> to vector<1x16xi32>
    %c0_12 = arith.constant 0 : index
    %c0_13 = arith.constant 0 : index
    %c0_14 = arith.constant 0 : index
    %44 = vector.load %arg3[%c0_12, %c0_13, %c0_14] : memref<1x1x16xi32, #tpu.memory_space<vmem>>, vector<1x1x16xi32>
    %45 = vector.shape_cast %44 : vector<1x1x16xi32> to vector<1x16xi32>
    %46 = vector.shape_cast %43 : vector<1x16xi32> to vector<1x1x16xi32>
    tpu.vector_store %arg3[%c0_12, %c0_13, %c0_14], %46 {strides = array<i32>} : memref<1x1x16xi32, #tpu.memory_space<vmem>>, vector<1x1x16xi32>,
    return
  }
  func.func @transform_0(%arg0: i32) -> (i32, i32, i32) {
    %c0_i32 = arith.constant 0 : i32
    %c0_i32_0 = arith.constant 0 : i32
    %c0_i32_1 = arith.constant 0 : i32
    return %arg0, %c0_i32, %c0_i32_0 : i32, i32, i32
  }
  func.func @transform_1(%arg0: i32) -> (i32, i32, i32) {
    %c0_i32 = arith.constant 0 : i32
    %c0_i32_0 = arith.constant 0 : i32
    %c0_i32_1 = arith.constant 0 : i32
    return %arg0, %c0_i32, %c0_i32_0 : i32, i32, i32
  }
  func.func @transform_2(%arg0: i32) -> (i32, i32, i32) {
    %c0_i32 = arith.constant 0 : i32
    %c0_i32_0 = arith.constant 0 : i32
    %c0_i32_1 = arith.constant 0 : i32
    return %arg0, %c0_i32, %c0_i32_0 : i32, i32, i32
  }
}

</mosaic_0001>

<bundles_post_ra>
// kernel: maws_forward.1
= control target key start
LH: loop header
LB: loop body
LE: loop exit
PB: predicated region body
PF: predicated region fallthrough
CT: control target
= control target key end

     0   :  { %7 = vsyncpa [#allocation3], 0  ;;  %s545_s0 = inlined_call_operand.vmem [shape: f32[2,4,16], index: 0, kind: input, shape index: {}]   ;;  %s546_s1 = inlined_call_operand.vmem [shape: f32[2,4,16], index: 1, kind: input, shape index: {}]   ;;  %s547_s2 = inlined_call_operand.hbm [shape: s32[2,1,16], index: 2, kind: output, shape index: {}]  }
   0x1   :  { %9 = vsyncpa [#allocation3 + $0x1], 0  ;;  %s449_s9 = smov 0   ;;  %s451_s10 = smov 0  }
   0x2   :  { %s453_s11 = smov 0   ;;  %s455_s12 = smov 0  }
   0x3 LB: > { %s470_s13 = sadd.s32 4294967295, %s430_s12   ;;  %s315_s14 = sadd.s32 4294967294, %s430_s12   ;;  %s430_s12 = sphi %s455_s12, %s553_s12   ;;  %s426_s11 = sphi %s453_s11, %s552_s11   ;;  %s422_s10 = sphi %s451_s10, %s551_s10   ;;  %s418_s9 = sphi %s449_s9, %s550_s9  }
   0x4   : > { %s474_s15 = sadd.s32 1, %s430_s12   ;;  %s74_s16 = sadd.s32 1, %s426_s11 }
   0x5   : > { %s71_s17 = ssub.s32 %s430_s12, %s474_s15  ;;  %p84_p0 = scmp.ne.s32.totalorder %s426_s11, %s422_s10 }
   0x6   : > { %p72_p1 = scmp.eq.s32.totalorder %s71_s17, 0  ;;  %p85_p2 = scmp.eq.s32.totalorder %s470_s13, 1 }
   0x7   : > { %p90_p3 = scmp.ne.s32.totalorder %s422_s10, %s418_s9  ;;  %p91_p4 = scmp.eq.s32.totalorder %s315_s14, 1 }
   0x8   : > { %s485_s18 = scalar_select %p72_p1, %s426_s11, %s74_s16  }
   0x9   : > { %p487_p5 = por %p85_p2, %p84_p0  ;;  %p491_p6 = por %p91_p4, %p90_p3 }
   0xa   : > { %p318_p7 = scmp.ge.s32.totalorder %s430_s12, 1  ;;  %p123_p8 = scmp.lt.s32.totalorder %s430_s12, 3 }
   0xc   : > { %p124_p9 = pnand %p318_p7, %p123_p8 }
   0xd   : > { %p147_p10 = scmp.lt.s32.totalorder (!%p124_p9), %s470_s13, 1  ;;  %s145_s29 = sand.u32 (!%p124_p9), 1, %s422_s10  }
   0xe   : > { %127 = sbr.rel (%p124_p9) target bundleno = 365 (0x16d), region = 28  ;;  %s325_s30 = sshll.u32 (!%p124_p9), %s470_s13, 4 }
   0xf   : > { %s146_s3 = scalar_lea.vmem (!%p124_p9), [#allocation2], %s145_s29  ;;  %s246_s7 = scalar_lea.hbm (!%p124_p9), %s547_s2, %s325_s30 }
  0x10   : > { %s248_s4 = sshll.u32 (!%p124_p9), %s146_s3, 4  ;;  %s236_s8 = scalar_lea.sflag (!%p124_p9), [#allocation3], %s145_s29  ;;  %s249_s4 = int_to_ptr.vmem [resolvable:$true] %s248_s4 }
  0x11   : > { %s370_s14 = scalar_lea.vmem (!%p124_p9), %s249_s4, 16  ;;  %s433_s16 = smov (!%p124_p9), [#allocation2]  }
  0x12   : > { %p371_p11 = scmp.ne.s32.totalorder (!%p124_p9), %s249_s4, %s370_s14  ;;  %s374_s17 = sshll.u32 (!%p124_p9), %s433_s16, 4  ;;  %s375_s17 = int_to_ptr.vmem [resolvable:$false] %s374_s17 }
  0x13   : > { %s148_s21 = scalar_select %p147_p10, %s470_s13, 1  ;;  %vm156_vm0 = vcmask 125952   ;;  %v176_v8 = vlaneseq  ;;  %vm185_vm3 = vcmask 130048   ;;  %v432_v29 = vmov 0.0  }
  0x14   : > { %p372_p12 = pnand %p371_p11, %p487_p5  ;;  %s376_s13 = scalar_lea.vmem %s375_s17, 32 }
  0x15   : > { %s319_s22 = sshll.u32 %s148_s21, 2  ;;  %v177_v13 = vshrl.u32 %v176_v8, 7  ;;  %v180_v16 = vand.u32 127, %v176_v8  ;;  %p377_p0 = scmp.lt.s32.totalorder %s249_s4, %s375_s17 }
  0x16   : > { %s150_s25 = scalar_lea.vmem %s545_s0, %s319_s22  ;;  %s154_s28 = scalar_lea.vmem %s546_s1, %s319_s22 }
  0x17   : > { %v155_v0 = vld [vmem:[%s150_s25] sm:$0xf]  ;;  %v178_v17 = vadd.s32 8, %v177_v13  ;;  %vm181_vm1 = vcmp.eq.s32.totalorder %v177_v13, %v180_v16  ;;  %vm196_vm4 = vcmp.lt.s32.totalorder %v180_v16, %v177_v13  ;;  %v212_v34 = vcvt.s32.f32 %v180_v16  ;;  %p373_p13 = pneg %p372_p12  ;;  %p378_p1 = scmp.lt.s32.totalorder %s376_s13, %s370_s14 }
  0x18   : > { %v166_v1 = vld [vmem:[%s154_s28] sm:$0xf]  ;;  %v157_v2 = vsel %vm156_vm0, %v155_v0, 0.0  ;;  %v219_v35 = vcvt.s32.f32 %v177_v13 }
  0x19   : > { %v167_v3 = vsel %vm156_vm0, %v166_v1, 0.0  ;;  %v158_v4 = vrot.slane %v157_v2, 4  ;;  %vm182_vm2 = vcmp.eq.s32.totalorder %v178_v17, %v180_v16  ;;  %vm197_vm8 = vcmp.lt.s32.totalorder %v180_v16, %v178_v17  ;;  %p379_p2 = por %p378_p1, %p377_p0 }
  0x1a   : > { %v168_v5 = vrot.slane %v167_v3, 4  ;;  %v220_v39 = vcvt.s32.f32 %v178_v17  ;;  %vm233_vm0 = vcmask 122880  }
  0x1b   : > { %v159_v6 = vadd.f32 %v158_v4, %v157_v2  ;;  %p380_p3 = pnand %p379_p2, %p373_p13 }
  0x1c   : > { %v169_v7 = vadd.f32 %v168_v5, %v167_v3 }
  0x1d   : > { %v160_v9 = vrot.slane %v159_v6, 2 }
  0x1e   : > { %v170_v10 = vrot.slane %v169_v7, 2 }
  0x1f   : > { %v161_v11 = vadd.f32 %v160_v9, %v159_v6 }
  0x20   : > { %v171_v12 = vadd.f32 %v170_v10, %v169_v7 }
  0x21   : > { %v162_v14 = vrot.slane %v161_v11, 1 }
  0x22   : > { %v172_v15 = vrot.slane %v171_v12, 1 }
  0x23   : > { %v163_v18 = vadd.f32 %v162_v14, %v161_v11 }
  0x24   : > { %v173_v19 = vadd.f32 %v172_v15, %v171_v12 }
  0x25   : > { %v165_v20 = vmul.f32 0.25, %v163_v18 }
  0x26   : > { %v174_v21 = vmul.f32 0.25, %v173_v19 }
  0x28   : > { %v175_v22 = vmul.f32 %v174_v21, %v165_v20 }
  0x2a   : > { %v183_v23 = vsel %vm181_vm1, %v175_v22, 0.0  ;;  %v184_v24 = vsel %vm182_vm2, %v175_v22, 0.0 }
  0x2b   : > { %v186_v25 = vsel %vm185_vm3, %v183_v23, 0.0  ;;  %v189_v26 = vsel %vm185_vm3, %v184_v24, 0.0 }
  0x2c   : > { %187 = vadd.xlane.f32.xlu0 %v186_v25 }
  0x30   : > { %190 = vadd.xlane.f32.xlu0 %v189_v26 }
  0xb5   : > { %v188_v27 = vpop.xlane.xlu0 %187 }
  0xb6   : > { %vm192_vm5 = vcmp.gt.f32.partialorder %v175_v22, %v188_v27  ;;  %vm194_vm6 = vcmp.eq.f32.partialorder %v175_v22, %v188_v27 }
  0xb7   : > { %vm198_vm7 = vmand %vm194_vm6, %vm196_vm4 }
  0xb8   : > { %vm200_vm9 = vmor %vm192_vm5, %vm198_vm7 }
  0xb9   : > { %v191_v28 = vpop.xlane.xlu0 %190  ;;  %v321_v30 = vsel %vm200_vm9, 1.0, %v432_v29 }
  0xba   : > { %vm193_vm10 = vcmp.gt.f32.partialorder %v175_v22, %v191_v28  ;;  %vm195_vm11 = vcmp.eq.f32.partialorder %v175_v22, %v191_v28  ;;  %v206_v31 = vsel %vm185_vm3, %v321_v30, 0.0 }
  0xbb   : > { %vm199_vm12 = vmand %vm195_vm11, %vm197_vm8  ;;  %207 = vadd.xlane.f32.xlu1 %v206_v31 }
  0xbc   : > { %vm201_vm13 = vmor %vm193_vm10, %vm199_vm12 }
  0xbd   : > { %v322_v32 = vsel %vm201_vm13, 1.0, %v432_v29 }
  0xbe   : > { %v209_v33 = vsel %vm185_vm3, %v322_v32, 0.0 }
  0xbf   : > { %210 = vadd.xlane.f32.xlu1 %v209_v33 }
 0x144   : > { %v208_v36 = vpop.xlane.xlu1 %207 }
 0x145   : > { %vm213_vm14 = vcmp.eq.f32.partialorder %v208_v36, %v212_v34 }
 0x146   : > { %v323_v37 = vsel %vm213_vm14, 1.0, %v432_v29 }
 0x147   : > { %v221_v38 = vmul.f32 %v323_v37, %v219_v35 }
 0x148   : > { %v211_v40 = vpop.xlane.xlu1 %210 }
 0x149   : > { %vm214_vm15 = vcmp.eq.f32.partialorder %v211_v40, %v212_v34  ;;  %v223_v43 = vsel %vm185_vm3, %v221_v38, 0.0 }
 0x14a   : > { %v324_v41 = vsel %vm214_vm15, 1.0, %v432_v29 }
 0x14b   : > { %v222_v42 = vmul.f32 %v324_v41, %v220_v39 }
 0x14d   : > { %v224_v44 = vsel %vm185_vm3, %v222_v42, 0.0 }
 0x14e   : > { %v225_v45 = vadd.f32 %v224_v44, %v223_v43 }
 0x150   : > { %v226_v46 = vrot.slane %v225_v45, 4 }
 0x152   : > { %v227_v47 = vadd.f32 %v226_v46, %v225_v45 }
 0x154   : > { %v228_v48 = vrot.slane %v227_v47, 2 }
 0x156   : > { %v229_v49 = vadd.f32 %v228_v48, %v227_v47 }
 0x158   : > { %v230_v50 = vrot.slane %v229_v49, 1 }
 0x15a   : > { %v231_v51 = vadd.f32 %v230_v50, %v229_v49 }
 0x15c   : > { %v328_v52 = vtrunc.f32 %v231_v51 }
 0x15e   : > { %v329_v53 = vcvt.f32.s32 %v328_v52 }
 0x160   : > { %234 = vst.msk [vmem:[%s146_s3] sm:$0x1] %vm233_vm0, %v329_v53 }
 0x161   : > { %383 = shalt.err (!%p380_p3)
}
 0x162   : > { %s384_s21 = scalar_lea.hbm %s246_s7, 16  ;;  %s388_s24 = scalar_lea.hbm %s547_s2, 32 }
 0x163   : > { %p385_p4 = scmp.ne.s32.totalorder %s246_s7, %s384_s21  ;;  %p389_p9 = scmp.lt.s32.totalorder %s246_s7, %s547_s2 }
 0x164   : > { %p390_p10 = scmp.lt.s32.totalorder %s388_s24, %s384_s21 }
 0x165   : > { %p386_p7 = pnand %p385_p4, %p487_p5 }
 0x166   : > { %p391_p11 = por %p390_p10, %p389_p9 }
 0x167   : > { %p387_p8 = pneg %p386_p7 }
 0x169   : > { %p392_p12 = pnand %p391_p11, %p387_p8 }
 0x16b   : > { %395 = shalt.err (!%p392_p12)
}
 0x16c   : > { %330 = dma.vmem_to_hbm [thread:$0]  (%p487_p5), %s249_s4, 16, %s246_s7, %s236_s8  }
 0x16d PF: > { %p336_p13 = scmp.ge.s32.totalorder %s430_s12, 2  ;;  %s260_s27 = sand.u32 1, %s418_s9  }
 0x16e   : > { %s261_s28 = scalar_lea.sflag [#allocation3], %s260_s27 }
 0x16f   : > { %p333_p0 = pnand %p336_p13, %p491_p6 }
 0x171   : > { %p334_p1 = pneg %p333_p0 }
 0x173   : > { %413 = dma.done.wait (%p334_p1), %s261_s28, 16  }
 0x174   : > { %415 = vsyncadd (%p334_p1), %s261_s28, 4294967280  ;;  %p12_p2 = scmp.ge.s32.totalorder %s474_s15, 4   ;;  %s550_s9 = smov %s422_s10 }
 0x175   : > { %s551_s10 = smov %s426_s11  ;;  %s552_s11 = smov %s485_s18 }
 0x176   : > { %s553_s12 = smov %s474_s15  ;;  %14 = sbr.rel (!%p12_p2) target bundleno = 3 (0x3), region = 66 }
 0x17b   :  { %265 = vsyncpa [#allocation3], 1 }
 0x17c   :  { %267 = vsyncpa [#allocation3 + $0x1], 1 }

</bundles_post_ra>
